<compile_context>
chip_gen: v7x
topology: tpu7x:2x2x1
jax: 0.10.0
libtpu: 0.0.40
codegen_flags: <defaults>
</compile_context>

<pallas_src>
import functools

import jax
import jax.numpy as jnp
from jax.experimental import pallas as pl
from jax.experimental.pallas import tpu as pltpu


# ----------------------------------------------------------------------------
# Fused Pallas kernel: encoder -> [seg1|sr1] -> all heads, per pixel tile.
# ----------------------------------------------------------------------------
def _fused_srseg_kernel(x_ref, enc_w_ref, enc_b_ref, mid_w_ref, mid_b_ref,
                        heads_w_ref, heads_b_ref, o_ref, *, fa_lo):
    # Stage 1: encoder 1x1 conv + bias + ReLU (f32 MXU accumulation).
    h = jnp.dot(x_ref[...], enc_w_ref[...], preferred_element_type=jnp.float32)
    h = jnp.maximum(h + enc_b_ref[...], 0.0).astype(jnp.bfloat16)

    # Stage 2: fused [seg1 | sr1 | zero-pad] conv + bias + ReLU.
    # F[:, :c_mid] = feature_seg, F[:, c_mid:2*c_mid] = feature_sr, rest = 0.
    f = jnp.dot(h, mid_w_ref[...], preferred_element_type=jnp.float32)
    f = jnp.maximum(f + mid_b_ref[...], 0.0).astype(jnp.bfloat16)

    # Stage 3: all heads fused into one lane-dense (multiple-of-128-wide)
    # matmul: [seg2 | sr2 | feature_sr passthrough | FA (BN folded) | pad].
    # TODO(synk): at real scale (c_backbone=2048) add K/N grid axes with an
    # f32 VMEM accumulator; the bias/ReLU/FA-gate epilogue and the bf16 store
    # below must then be gated with pl.when on the last K step.
    y = jnp.dot(f, heads_w_ref[...], preferred_element_type=jnp.float32)
    y = y + heads_b_ref[...]
    # FA is the last real slab before the zero padding, so a single
    # `col >= fa_lo` compare suffices (ReLU is a no-op on zero padding cols).
    col = jax.lax.broadcasted_iota(jnp.int32, (1, y.shape[1]), 1)
    y = jnp.where(col >= fa_lo, jnp.maximum(y, 0.0), y)
    o_ref[...] = y.astype(o_ref.dtype)


def _choose_tile(m):
    """Pixel tile: cap at 1024, prefer exact divisors of m and >= 8 blocks.

    >= 8 grid blocks total means >= 4 per v7x TensorCore, so the software
    pipeline actually overlaps DMA with compute; exact divisors avoid dead
    padded rows and the trailing y[:m] slice copy.
    """
    candidates = [t for t in (1024, 512, 256, 128, 64, 32, 16) if t <= m]
    for t in candidates:                      # exact divisor, >= 8 blocks
        if m % t == 0 and m // t >= 8:
            return t
    for t in candidates:                      # exact divisor, >= 2 blocks
        if m % t == 0 and m // t >= 2:
            return t
    for t in candidates:                      # padded, >= 8 blocks
        if pl.cdiv(m, t) >= 8:
            return t
    return 16


def _vmem_budget_bytes(tm, cin_pad, c_backbone, c_mid2, c_out, weight_bytes,
                       single_buffer_weights):
    """Scoped VMEM limit computed from actual buffer sizes, with headroom."""
    wmult = 1 if single_buffer_weights else 2
    io = 2 * tm * cin_pad * 2 + 2 * tm * c_out * 2        # bf16 in/out, x2 buf
    inter = tm * (c_backbone + c_mid2 + 2 * c_out) * 4    # f32 intermediates
    total = wmult * weight_bytes + io + inter
    # 2x headroom, but stay well under v7x's 64 MiB physical VMEM.
    return int(min(max(2 * total, 8 * 1024 * 1024), 48 * 1024 * 1024))


def _fused_pallas_call(x_pad, fused, meta, single_buffer_weights=True):
    m, cin_pad = x_pad.shape
    c_out = meta["c_out"]
    c_backbone = fused["enc_w"].shape[1]
    c_mid2 = fused["mid_w"].shape[1]

    tm = _choose_tile(m)
    m_pad = pl.cdiv(m, tm) * tm
    if m_pad != m:
        x_pad = jnp.pad(x_pad, ((0, m_pad - m), (0, 0)))
    grid = (m_pad // tm,)

    fa_lo, _ = meta["offsets"]["fa"]
    kernel = functools.partial(_fused_srseg_kernel, fa_lo=fa_lo)

    def w_spec(shape):
        # Constant index_map: fetched once, VMEM-resident across grid steps.
        # Single-buffer so the (real-scale) weight slabs are not doubled.
        if single_buffer_weights:
            return pl.BlockSpec(shape, lambda i: (0, 0),
                                pipeline_mode=pl.Buffered(1))
        return pl.BlockSpec(shape, lambda i: (0, 0))

    weight_bytes = sum(int(a.size) * a.dtype.itemsize for a in
                       (fused["enc_w"], fused["enc_b"], fused["mid_w"],
                        fused["mid_b"], fused["heads_w"], fused["heads_b"]))
    vmem_bytes = _vmem_budget_bytes(tm, cin_pad, c_backbone, c_mid2, c_out,
                                    weight_bytes, single_buffer_weights)

    y = pl.pallas_call(
        kernel,
        # bf16 output slab: kernel is writeback-bound, this halves HBM writes
        # and the downstream slice/transpose/pixel-shuffle re-reads.
        out_shape=jax.ShapeDtypeStruct((m_pad, c_out), jnp.bfloat16),
        grid_spec=pl.GridSpec(
            grid=grid,
            in_specs=[
                pl.BlockSpec((tm, cin_pad), lambda i: (i, 0)),
                w_spec((cin_pad, c_backbone)),
                w_spec((1, c_backbone)),
                w_spec((c_backbone, c_mid2)),
                w_spec((1, c_mid2)),
                w_spec((c_mid2, c_out)),
                w_spec((1, c_out)),
            ],
            out_specs=pl.BlockSpec((tm, c_out), lambda i: (i, 0)),
        ),
        compiler_params=pltpu.CompilerParams(
            dimension_semantics=("parallel",),      # shard pixel axis over TCs
            vmem_limit_bytes=vmem_bytes),
    )(x_pad, fused["enc_w"], fused["enc_b"], fused["mid_w"], fused["mid_b"],
      fused["heads_w"], fused["heads_b"])
    return y if m_pad == m else y[:m]


# ----------------------------------------------------------------------------
# Host-side weight packing (f32 folds, then bf16 cast).  Called ONCE.
# ----------------------------------------------------------------------------
def build_fused_params(params, up_scale):
    f32 = jnp.float32
    enc_w = params["enc_w"].astype(f32)
    cin, c_backbone = enc_w.shape
    c_mid = c_backbone // up_scale
    c_seg2 = params["seg2_w"].shape[1]
    c_sr2 = params["sr2_w"].shape[1]

    # Encoder: pad Cin (3) up to a multiple of 8 with zero rows.
    cin_pad = ((cin + 7) // 8) * 8
    enc_w = jnp.pad(enc_w, ((0, cin_pad - cin), (0, 0)))

    # Mid stage: seg1 and sr1 share the backbone input -> one matmul.
    # Zero-pad the output width up to a multiple of 128 so the intermediate
    # F tile is lane-dense and fully feeds the heads matmul's K dimension.
    c_mid2 = 2 * c_mid
    c_mid2_pad = max(128, ((c_mid2 + 127) // 128) * 128)
    mid_w = jnp.concatenate([params["seg1_w"].astype(f32),
                             params["sr1_w"].astype(f32)], axis=1)
    mid_b = jnp.concatenate([params["seg1_b"], params["sr1_b"]]).astype(f32)
    mid_w = jnp.pad(mid_w, ((0, 0), (0, c_mid2_pad - c_mid2)))
    mid_b = jnp.pad(mid_b, ((0, c_mid2_pad - c_mid2),))

    # Heads acting on F = [feature_seg | feature_sr | 0-pad].  Fold BN (eval)
    # into FA in f32:  s = gamma/sqrt(var+eps),  t = beta - mean*s.
    eps = 1e-5
    s = params["fa_bn_gamma"] / jnp.sqrt(params["fa_bn_var"] + eps)
    fa_w = params["fa_w"] * s[None, :]
    fa_b = params["fa_b"] * s + (params["fa_bn_beta"] - params["fa_bn_mean"] * s)

    c_heads = c_seg2 + c_sr2 + c_mid + c_mid
    c_out = max(128, ((c_heads + 127) // 128) * 128)   # lane-dense output slab
    heads_w = jnp.zeros((c_mid2_pad, c_out), f32)
    heads_b = jnp.zeros((c_out,), f32)

    offsets = {}
    o = 0
    # seg2 head (reads feature_seg = F[:, :c_mid])
    heads_w = heads_w.at[:c_mid, o:o + c_seg2].set(params["seg2_w"])
    heads_b = heads_b.at[o:o + c_seg2].set(params["seg2_b"])
    offsets["seg2"] = (o, c_seg2); o += c_seg2
    # sr2 head (reads feature_sr = F[:, c_mid:2*c_mid])
    heads_w = heads_w.at[c_mid:c_mid2, o:o + c_sr2].set(params["sr2_w"])
    heads_b = heads_b.at[o:o + c_sr2].set(params["sr2_b"])
    offsets["sr2"] = (o, c_sr2); o += c_sr2
    # feature_sr passthrough (identity, exact in bf16)
    heads_w = heads_w.at[c_mid:c_mid2, o:o + c_mid].set(jnp.eye(c_mid, dtype=f32))
    offsets["feat_sr"] = (o, c_mid); o += c_mid
    # FA head LAST before the zero padding (reads feature_seg), BN folded;
    # ReLU applied in-kernel with a single >= compare.
    heads_w = heads_w.at[:c_mid, o:o + c_mid].set(fa_w)
    heads_b = heads_b.at[o:o + c_mid].set(fa_b)
    offsets["fa"] = (o, c_mid); o += c_mid

    fused = {
        "enc_w": enc_w.astype(jnp.bfloat16),
        "enc_b": params["enc_b"].reshape(1, -1).astype(f32),
        "mid_w": mid_w.astype(jnp.bfloat16),
        "mid_b": mid_b.reshape(1, -1).astype(f32),
        "heads_w": heads_w.astype(jnp.bfloat16),
        "heads_b": heads_b.reshape(1, -1).astype(f32),
    }
    meta = {"cin": int(cin), "cin_pad": int(cin_pad), "c_mid": int(c_mid),
            "c_out": int(c_out), "offsets": offsets}
    return fused, meta


# ----------------------------------------------------------------------------
# Boundary layout plumbing (plain JAX; consumes the bf16 slab, promotes late).
# ----------------------------------------------------------------------------
def _pixel_shuffle_from_nhwc(x_nhwc, r):
    """PixelShuffle with PyTorch channel order (c, r1, r2): NHWC_lr -> NCHW_hr."""
    n, h, w, crr = x_nhwc.shape
    c = crr // (r * r)
    x = x_nhwc.reshape(n, h, w, c, r, r)
    x = jnp.transpose(x, (0, 3, 1, 4, 2, 5))
    return x.reshape(n, c, h * r, w * r)


def _heads_to_outputs(y, n, h, w, meta, up_scale):
    off = meta["offsets"]

    def pick(name):
        o, c = off[name]
        return y[:, o:o + c].reshape(n, h, w, c)   # stays bf16

    # Promote to f32 only at the very end (module contract is f32 tensors).
    img_sr = _pixel_shuffle_from_nhwc(pick("sr2"), up_scale).astype(jnp.float32)
    seg_pre = _pixel_shuffle_from_nhwc(pick("seg2"), up_scale).astype(jnp.float32)
    feature_sr = jnp.transpose(pick("feat_sr"), (0, 3, 1, 2)).astype(jnp.float32)
    feature_seg_fa = jnp.transpose(pick("fa"), (0, 3, 1, 2)).astype(jnp.float32)
    return img_sr, seg_pre, feature_sr, feature_seg_fa


def srseg_forward(fused, img_lr, *, meta, up_scale, single_buffer_weights=True):
    n, cin, h, w = img_lr.shape
    x = jnp.transpose(img_lr, (0, 2, 3, 1)).reshape(n * h * w, cin)
    x = jnp.pad(x, ((0, 0), (0, meta["cin_pad"] - cin))).astype(jnp.bfloat16)
    y = _fused_pallas_call(x, fused, meta, single_buffer_weights)
    return _heads_to_outputs(y, n, h, w, meta, up_scale)


# ----------------------------------------------------------------------------
# Pure-JAX reference (unfused structure, emulating the kernel's bf16 points).
# ----------------------------------------------------------------------------
def _bf(a):
    return a.astype(jnp.bfloat16).astype(jnp.float32)


def _bf16_dot(a, b):
    return jnp.dot(a.astype(jnp.bfloat16), b.astype(jnp.bfloat16),
                   preferred_element_type=jnp.float32)


def reference_forward(params, img_lr, up_scale):
    n, cin, h, w = img_lr.shape
    x = jnp.transpose(img_lr, (0, 2, 3, 1)).reshape(n * h * w, cin)
    hid = _bf(jnp.maximum(_bf16_dot(x, params["enc_w"]) + params["enc_b"], 0.0))
    feat_seg = _bf(jnp.maximum(
        _bf16_dot(hid, params["seg1_w"]) + params["seg1_b"], 0.0))
    feat_sr = _bf(jnp.maximum(
        _bf16_dot(hid, params["sr1_w"]) + params["sr1_b"], 0.0))
    # Kernel stores the fused head slab in bf16 -> emulate with _bf.
    seg_pre_lr = _bf(_bf16_dot(feat_seg, params["seg2_w"]) + params["seg2_b"])
    img_sr_lr = _bf(_bf16_dot(feat_sr, params["sr2_w"]) + params["sr2_b"])
    eps = 1e-5
    s = params["fa_bn_gamma"] / jnp.sqrt(params["fa_bn_var"] + eps)
    t = params["fa_bn_beta"] - params["fa_bn_mean"] * s
    fa = _bf(jnp.maximum(_bf16_dot(feat_seg, params["fa_w"] * s[None, :])
                         + (params["fa_b"] * s + t), 0.0))

    def to_nhwc(a):
        return a.reshape(n, h, w, a.shape[-1])

    seg_pre = _pixel_shuffle_from_nhwc(to_nhwc(seg_pre_lr), up_scale)
    img_sr = _pixel_shuffle_from_nhwc(to_nhwc(img_sr_lr), up_scale)
    return (img_sr, seg_pre,
            jnp.transpose(to_nhwc(feat_sr), (0, 3, 1, 2)),
            jnp.transpose(to_nhwc(fa), (0, 3, 1, 2)))


# ----------------------------------------------------------------------------
# Parameter construction (deterministic, synthetic).
# ----------------------------------------------------------------------------
def make_params(key, c_in, c_backbone, up_scale, num_classes):
    c_mid = c_backbone // up_scale
    ks = jax.random.split(key, 12)

    def w(k, ci, co, s=0.2):
        return jax.random.normal(k, (ci, co), jnp.float32) * s

    return {
        # Encoder (simplified stand-in)
        "enc_w": w(ks[0], c_in, c_backbone),
        "enc_b": jax.random.normal(ks[1], (c_backbone,), jnp.float32) * 0.05,
        # SegBranch
        "seg1_w": w(ks[2], c_backbone, c_mid),
        "seg1_b": jax.random.normal(ks[3], (c_mid,), jnp.float32) * 0.05,
        "seg2_w": w(ks[4], c_mid, num_classes * up_scale * up_scale),
        "seg2_b": jnp.zeros((num_classes * up_scale * up_scale,), jnp.float32),
        # SRBranch
        "sr1_w": w(ks[5], c_backbone, c_mid),
        "sr1_b": jax.random.normal(ks[6], (c_mid,), jnp.float32) * 0.05,
        "sr2_w": w(ks[7], c_mid, 3 * up_scale * up_scale),
        "sr2_b": jnp.zeros((3 * up_scale * up_scale,), jnp.float32),
        # FABranch: Conv2d(c_mid, c_mid, 1) + BatchNorm2d(c_mid) + ReLU
        "fa_w": w(ks[8], c_mid, c_mid),
        "fa_b": jax.random.normal(ks[9], (c_mid,), jnp.float32) * 0.05,
        "fa_bn_gamma": 1.0 + 0.1 * jax.random.normal(ks[10], (c_mid,), jnp.float32),
        "fa_bn_beta": 0.05 * jax.random.normal(ks[11], (c_mid,), jnp.float32),
        "fa_bn_mean": jnp.linspace(-0.1, 0.1, c_mid, dtype=jnp.float32),
        "fa_bn_var": jnp.linspace(0.5, 1.5, c_mid, dtype=jnp.float32),
    }


# ----------------------------------------------------------------------------
if __name__ == "__main__":
    batch, c_in, H, W = 2, 3, 16, 16
    up_scale = 2
    num_classes = 4
    c_backbone = 64   # scaled-down stand-in for the ResNet's 2048 channels

    key = jax.random.PRNGKey(0)
    k_img, k_par = jax.random.split(key)
    img_lr = jax.random.normal(k_img, (batch, c_in, H, W), jnp.float32)
    params = make_params(k_par, c_in, c_backbone, up_scale, num_classes)

    # Build/cast the fused bf16 weight pack ONCE, outside the jitted forward.
    fused, meta = build_fused_params(params, up_scale)

    def make_forward(single_buffer_weights):
        return jax.jit(functools.partial(
            srseg_forward, meta=meta, up_scale=up_scale,
            single_buffer_weights=single_buffer_weights))

    fwd = make_forward(True)
    try:
        outs = jax.block_until_ready(fwd(fused, img_lr))
    except Exception:
        # TODO(synk): pl.Buffered(1) single-buffered weight operands rejected
        # by this jax/Mosaic version; fall back to default double buffering
        # (identical numerics, only the VMEM footprint differs).
        fwd = make_forward(False)
        outs = jax.block_until_ready(fwd(fused, img_lr))

    img_sr, seg_pre, feature_sr, feature_seg_FA = outs

    c_mid = c_backbone // up_scale
    assert img_sr.shape == (batch, 3, H * up_scale, W * up_scale)
    assert seg_pre.shape == (batch, num_classes, H * up_scale, W * up_scale)
    assert feature_sr.shape == (batch, c_mid, H, W)
    assert feature_seg_FA.shape == (batch, c_mid, H, W)

    ref = reference_forward(params, img_lr, up_scale)
    for got, want in zip(outs, ref):
        assert got.shape == want.shape
        assert bool(jnp.all(jnp.isfinite(got)))
        assert bool(jnp.allclose(got, want, rtol=1e-2, atol=1e-2)), (
            float(jnp.max(jnp.abs(got - want))))

    print("KERNEL_OK")
</pallas_src>

<mosaic_0001>
module attributes {stable_mosaic.version = 11 : i64} {
  func.func @_fused_srseg_kernel(%arg0: i32, %arg1: memref<64x8xbf16, #tpu.memory_space<vmem>>, %arg2: memref<8x64xbf16, #tpu.memory_space<vmem>>, %arg3: memref<1x64xf32, #tpu.memory_space<vmem>>, %arg4: memref<64x128xbf16, #tpu.memory_space<vmem>>, %arg5: memref<1x128xf32, #tpu.memory_space<vmem>>, %arg6: memref<128x128xbf16, #tpu.memory_space<vmem>>, %arg7: memref<1x128xf32, #tpu.memory_space<vmem>>, %arg8: memref<64x128xbf16, #tpu.memory_space<vmem>>) attributes {dimension_semantics = [#tpu.dimension_semantics<parallel>], iteration_bounds = array<i64: 8>, scalar_prefetch = 0 : i64, scratch_operands = 0 : i64, tpu.core_type = #tpu.core_type<tc>, window_params = [{transform_indices = @transform_0, window_bounds = array<i64: 64, 8>}, {pipeline_mode = #tpu.pipeline_mode<synchronous>, transform_indices = @transform_1, window_bounds = array<i64: 8, 64>}, {pipeline_mode = #tpu.pipeline_mode<synchronous>, transform_indices = @transform_2, window_bounds = array<i64: 1, 64>}, {pipeline_mode = #tpu.pipeline_mode<synchronous>, transform_indices = @transform_3, window_bounds = array<i64: 64, 128>}, {pipeline_mode = #tpu.pipeline_mode<synchronous>, transform_indices = @transform_4, window_bounds = array<i64: 1, 128>}, {pipeline_mode = #tpu.pipeline_mode<synchronous>, transform_indices = @transform_5, window_bounds = array<i64: 128, 128>}, {pipeline_mode = #tpu.pipeline_mode<synchronous>, transform_indices = @transform_6, window_bounds = array<i64: 1, 128>}, {transform_indices = @transform_7, window_bounds = array<i64: 64, 128>}]} {
    %c0 = arith.constant 0 : index
    %c0_0 = arith.constant 0 : index
    %0 = vector.load %arg1[%c0, %c0_0] : memref<64x8xbf16, #tpu.memory_space<vmem>>, vector<64x8xbf16>
    %c0_1 = arith.constant 0 : index
    %c0_2 = arith.constant 0 : index
    %1 = vector.load %arg2[%c0_1, %c0_2] : memref<8x64xbf16, #tpu.memory_space<vmem>>, vector<8x64xbf16>
    %cst = arith.constant dense<0.000000e+00> : vector<64x64xf32>
    %2 = tpu.matmul %0, %1, %cst {dimension_numbers = #tpu.dot_dimension_numbers<[1], [0], [0], [1], [0, 0, 1, 1], [], []>} : vector<64x8xbf16>, vector<8x64xbf16>, vector<64x64xf32> -> vector<64x64xf32>
    %c0_3 = arith.constant 0 : index
    %c0_4 = arith.constant 0 : index
    %3 = vector.load %arg3[%c0_3, %c0_4] : memref<1x64xf32, #tpu.memory_space<vmem>>, vector<1x64xf32>
    %4 = vector.broadcast %3 : vector<1x64xf32> to vector<64x64xf32>
    %5 = arith.addf %2, %4 : vector<64x64xf32>
    %cst_5 = arith.constant 0.000000e+00 : f32
    %6 = vector.broadcast %cst_5 : f32 to vector<64x64xf32>
    %7 = arith.maximumf %5, %6 : vector<64x64xf32>
    %8 = arith.truncf %7 : vector<64x64xf32> to vector<64x64xbf16>
    %c0_6 = arith.constant 0 : index
    %c0_7 = arith.constant 0 : index
    %9 = vector.load %arg4[%c0_6, %c0_7] : memref<64x128xbf16, #tpu.memory_space<vmem>>, vector<64x128xbf16>
    %cst_8 = arith.constant dense<0.000000e+00> : vector<64x128xf32>
    %10 = tpu.matmul %8, %9, %cst_8 {dimension_numbers = #tpu.dot_dimension_numbers<[1], [0], [0], [1], [0, 0, 1, 1], [], []>} : vector<64x64xbf16>, vector<64x128xbf16>, vector<64x128xf32> -> vector<64x128xf32>
    %c0_9 = arith.constant 0 : index
    %c0_10 = arith.constant 0 : index
    %11 = vector.load %arg5[%c0_9, %c0_10] : memref<1x128xf32, #tpu.memory_space<vmem>>, vector<1x128xf32>
    %12 = vector.broadcast %11 : vector<1x128xf32> to vector<64x128xf32>
    %13 = arith.addf %10, %12 : vector<64x128xf32>
    %cst_11 = arith.constant 0.000000e+00 : f32
    %14 = vector.broadcast %cst_11 : f32 to vector<64x128xf32>
    %15 = arith.maximumf %13, %14 : vector<64x128xf32>
    %16 = arith.truncf %15 : vector<64x128xf32> to vector<64x128xbf16>
    %c0_12 = arith.constant 0 : index
    %c0_13 = arith.constant 0 : index
    %17 = vector.load %arg6[%c0_12, %c0_13] : memref<128x128xbf16, #tpu.memory_space<vmem>>, vector<128x128xbf16>
    %cst_14 = arith.constant dense<0.000000e+00> : vector<64x128xf32>
    %18 = tpu.matmul %16, %17, %cst_14 {dimension_numbers = #tpu.dot_dimension_numbers<[1], [0], [0], [1], [0, 0, 1, 1], [], []>} : vector<64x128xbf16>, vector<128x128xbf16>, vector<64x128xf32> -> vector<64x128xf32>
    %c0_15 = arith.constant 0 : index
    %c0_16 = arith.constant 0 : index
    %19 = vector.load %arg7[%c0_15, %c0_16] : memref<1x128xf32, #tpu.memory_space<vmem>>, vector<1x128xf32>
    %20 = vector.broadcast %19 : vector<1x128xf32> to vector<64x128xf32>
    %21 = arith.addf %18, %20 : vector<64x128xf32>
    %22 = tpu.iota {dimensions = array<i32: 1>} : vector<1x128xi32>
    %c60_i32 = arith.constant 60 : i32
    %23 = vector.broadcast %c60_i32 : i32 to vector<1x128xi32>
    %24 = arith.cmpi sge, %22, %23 : vector<1x128xi32>
    %cst_17 = arith.constant 0.000000e+00 : f32
    %25 = vector.broadcast %cst_17 : f32 to vector<64x128xf32>
    %26 = arith.maximumf %21, %25 : vector<64x128xf32>
    %27 = vector.shape_cast %24 : vector<1x128xi1> to vector<1x128xi1>
    %28 = vector.broadcast %27 : vector<1x128xi1> to vector<64x128xi1>
    %29 = arith.select %28, %26, %21 : vector<64x128xi1>, vector<64x128xf32>
    %30 = arith.truncf %29 : vector<64x128xf32> to vector<64x128xbf16>
    %c0_18 = arith.constant 0 : index
    %c0_19 = arith.constant 0 : index
    %31 = vector.load %arg8[%c0_18, %c0_19] : memref<64x128xbf16, #tpu.memory_space<vmem>>, vector<64x128xbf16>
    tpu.vector_store %arg8[%c0_18, %c0_19], %30 {strides = array<i32>} : memref<64x128xbf16, #tpu.memory_space<vmem>>, vector<64x128xbf16>,
    return
  }
  func.func @transform_0(%arg0: i32) -> (i32, i32) {
    %c0_i32 = arith.constant 0 : i32
    %c0_i32_0 = arith.constant 0 : i32
    return %arg0, %c0_i32 : i32, i32
  }
  func.func @transform_1(%arg0: i32) -> (i32, i32) {
    %c0_i32 = arith.constant 0 : i32
    %c0_i32_0 = arith.constant 0 : i32
    %c0_i32_1 = arith.constant 0 : i32
    return %c0_i32, %c0_i32_0 : i32, i32
  }
  func.func @transform_2(%arg0: i32) -> (i32, i32) {
    %c0_i32 = arith.constant 0 : i32
    %c0_i32_0 = arith.constant 0 : i32
    %c0_i32_1 = arith.constant 0 : i32
    return %c0_i32, %c0_i32_0 : i32, i32
  }
  func.func @transform_3(%arg0: i32) -> (i32, i32) {
    %c0_i32 = arith.constant 0 : i32
    %c0_i32_0 = arith.constant 0 : i32
    %c0_i32_1 = arith.constant 0 : i32
    return %c0_i32, %c0_i32_0 : i32, i32
  }
  func.func @transform_4(%arg0: i32) -> (i32, i32) {
    %c0_i32 = arith.constant 0 : i32
    %c0_i32_0 = arith.constant 0 : i32
    %c0_i32_1 = arith.constant 0 : i32
    return %c0_i32, %c0_i32_0 : i32, i32
  }
  func.func @transform_5(%arg0: i32) -> (i32, i32) {
    %c0_i32 = arith.constant 0 : i32
    %c0_i32_0 = arith.constant 0 : i32
    %c0_i32_1 = arith.constant 0 : i32
    return %c0_i32, %c0_i32_0 : i32, i32
  }
  func.func @transform_6(%arg0: i32) -> (i32, i32) {
    %c0_i32 = arith.constant 0 : i32
    %c0_i32_0 = arith.constant 0 : i32
    %c0_i32_1 = arith.constant 0 : i32
    return %c0_i32, %c0_i32_0 : i32, i32
  }
  func.func @transform_7(%arg0: i32) -> (i32, i32) {
    %c0_i32 = arith.constant 0 : i32
    %c0_i32_0 = arith.constant 0 : i32
    return %arg0, %c0_i32 : i32, i32
  }
}

module attributes {stable_mosaic.version = 11 : i64} {
  func.func @_fused_srseg_kernel(%arg0: i32, %arg1: memref<64x8xbf16, #tpu.memory_space<vmem>>, %arg2: memref<8x64xbf16, #tpu.memory_space<vmem>>, %arg3: memref<1x64xf32, #tpu.memory_space<vmem>>, %arg4: memref<64x128xbf16, #tpu.memory_space<vmem>>, %arg5: memref<1x128xf32, #tpu.memory_space<vmem>>, %arg6: memref<128x128xbf16, #tpu.memory_space<vmem>>, %arg7: memref<1x128xf32, #tpu.memory_space<vmem>>, %arg8: memref<64x128xbf16, #tpu.memory_space<vmem>>) attributes {dimension_semantics = [#tpu.dimension_semantics<parallel>], iteration_bounds = array<i64: 8>, scalar_prefetch = 0 : i64, scratch_operands = 0 : i64, tpu.core_type = #tpu.core_type<tc>, window_params = [{transform_indices = @transform_0, window_bounds = array<i64: 64, 8>}, {pipeline_mode = #tpu.pipeline_mode<synchronous>, transform_indices = @transform_1, window_bounds = array<i64: 8, 64>}, {pipeline_mode = #tpu.pipeline_mode<synchronous>, transform_indices = @transform_2, window_bounds = array<i64: 1, 64>}, {pipeline_mode = #tpu.pipeline_mode<synchronous>, transform_indices = @transform_3, window_bounds = array<i64: 64, 128>}, {pipeline_mode = #tpu.pipeline_mode<synchronous>, transform_indices = @transform_4, window_bounds = array<i64: 1, 128>}, {pipeline_mode = #tpu.pipeline_mode<synchronous>, transform_indices = @transform_5, window_bounds = array<i64: 128, 128>}, {pipeline_mode = #tpu.pipeline_mode<synchronous>, transform_indices = @transform_6, window_bounds = array<i64: 1, 128>}, {transform_indices = @transform_7, window_bounds = array<i64: 64, 128>}]} {
    %c0 = arith.constant 0 : index
    %c0_0 = arith.constant 0 : index
    %0 = vector.load %arg1[%c0, %c0_0] : memref<64x8xbf16, #tpu.memory_space<vmem>>, vector<64x8xbf16>
    %c0_1 = arith.constant 0 : index
    %c0_2 = arith.constant 0 : index
    %1 = vector.load %arg2[%c0_1, %c0_2] : memref<8x64xbf16, #tpu.memory_space<vmem>>, vector<8x64xbf16>
    %cst = arith.constant dense<0.000000e+00> : vector<64x64xf32>
    %2 = tpu.matmul %0, %1, %cst {dimension_numbers = #tpu.dot_dimension_numbers<[1], [0], [0], [1], [0, 0, 1, 1], [], []>} : vector<64x8xbf16>, vector<8x64xbf16>, vector<64x64xf32> -> vector<64x64xf32>
    %c0_3 = arith.constant 0 : index
    %c0_4 = arith.constant 0 : index
    %3 = vector.load %arg3[%c0_3, %c0_4] : memref<1x64xf32, #tpu.memory_space<vmem>>, vector<1x64xf32>
    %4 = vector.broadcast %3 : vector<1x64xf32> to vector<64x64xf32>
    %5 = arith.addf %2, %4 : vector<64x64xf32>
    %cst_5 = arith.constant 0.000000e+00 : f32
    %6 = vector.broadcast %cst_5 : f32 to vector<64x64xf32>
    %7 = arith.maximumf %5, %6 : vector<64x64xf32>
    %8 = arith.truncf %7 : vector<64x64xf32> to vector<64x64xbf16>
    %c0_6 = arith.constant 0 : index
    %c0_7 = arith.constant 0 : index
    %9 = vector.load %arg4[%c0_6, %c0_7] : memref<64x128xbf16, #tpu.memory_space<vmem>>, vector<64x128xbf16>
    %cst_8 = arith.constant dense<0.000000e+00> : vector<64x128xf32>
    %10 = tpu.matmul %8, %9, %cst_8 {dimension_numbers = #tpu.dot_dimension_numbers<[1], [0], [0], [1], [0, 0, 1, 1], [], []>} : vector<64x64xbf16>, vector<64x128xbf16>, vector<64x128xf32> -> vector<64x128xf32>
    %c0_9 = arith.constant 0 : index
    %c0_10 = arith.constant 0 : index
    %11 = vector.load %arg5[%c0_9, %c0_10] : memref<1x128xf32, #tpu.memory_space<vmem>>, vector<1x128xf32>
    %12 = vector.broadcast %11 : vector<1x128xf32> to vector<64x128xf32>
    %13 = arith.addf %10, %12 : vector<64x128xf32>
    %cst_11 = arith.constant 0.000000e+00 : f32
    %14 = vector.broadcast %cst_11 : f32 to vector<64x128xf32>
    %15 = arith.maximumf %13, %14 : vector<64x128xf32>
    %16 = arith.truncf %15 : vector<64x128xf32> to vector<64x128xbf16>
    %c0_12 = arith.constant 0 : index
    %c0_13 = arith.constant 0 : index
    %17 = vector.load %arg6[%c0_12, %c0_13] : memref<128x128xbf16, #tpu.memory_space<vmem>>, vector<128x128xbf16>
    %cst_14 = arith.constant dense<0.000000e+00> : vector<64x128xf32>
    %18 = tpu.matmul %16, %17, %cst_14 {dimension_numbers = #tpu.dot_dimension_numbers<[1], [0], [0], [1], [0, 0, 1, 1], [], []>} : vector<64x128xbf16>, vector<128x128xbf16>, vector<64x128xf32> -> vector<64x128xf32>
    %c0_15 = arith.constant 0 : index
    %c0_16 = arith.constant 0 : index
    %19 = vector.load %arg7[%c0_15, %c0_16] : memref<1x128xf32, #tpu.memory_space<vmem>>, vector<1x128xf32>
    %20 = vector.broadcast %19 : vector<1x128xf32> to vector<64x128xf32>
    %21 = arith.addf %18, %20 : vector<64x128xf32>
    %22 = tpu.iota {dimensions = array<i32: 1>} : vector<1x128xi32>
    %c60_i32 = arith.constant 60 : i32
    %23 = vector.broadcast %c60_i32 : i32 to vector<1x128xi32>
    %24 = arith.cmpi sge, %22, %23 : vector<1x128xi32>
    %cst_17 = arith.constant 0.000000e+00 : f32
    %25 = vector.broadcast %cst_17 : f32 to vector<64x128xf32>
    %26 = arith.maximumf %21, %25 : vector<64x128xf32>
    %27 = vector.shape_cast %24 : vector<1x128xi1> to vector<1x128xi1>
    %28 = vector.broadcast %27 : vector<1x128xi1> to vector<64x128xi1>
    %29 = arith.select %28, %26, %21 : vector<64x128xi1>, vector<64x128xf32>
    %30 = arith.truncf %29 : vector<64x128xf32> to vector<64x128xbf16>
    %c0_18 = arith.constant 0 : index
    %c0_19 = arith.constant 0 : index
    %31 = vector.load %arg8[%c0_18, %c0_19] : memref<64x128xbf16, #tpu.memory_space<vmem>>, vector<64x128xbf16>
    tpu.vector_store %arg8[%c0_18, %c0_19], %30 {strides = array<i32>} : memref<64x128xbf16, #tpu.memory_space<vmem>>, vector<64x128xbf16>,
    return
  }
  func.func @transform_0(%arg0: i32) -> (i32, i32) {
    %c0_i32 = arith.constant 0 : i32
    %c0_i32_0 = arith.constant 0 : i32
    return %arg0, %c0_i32 : i32, i32
  }
  func.func @transform_1(%arg0: i32) -> (i32, i32) {
    %c0_i32 = arith.constant 0 : i32
    %c0_i32_0 = arith.constant 0 : i32
    %c0_i32_1 = arith.constant 0 : i32
    return %c0_i32, %c0_i32_0 : i32, i32
  }
  func.func @transform_2(%arg0: i32) -> (i32, i32) {
    %c0_i32 = arith.constant 0 : i32
    %c0_i32_0 = arith.constant 0 : i32
    %c0_i32_1 = arith.constant 0 : i32
    return %c0_i32, %c0_i32_0 : i32, i32
  }
  func.func @transform_3(%arg0: i32) -> (i32, i32) {
    %c0_i32 = arith.constant 0 : i32
    %c0_i32_0 = arith.constant 0 : i32
    %c0_i32_1 = arith.constant 0 : i32
    return %c0_i32, %c0_i32_0 : i32, i32
  }
  func.func @transform_4(%arg0: i32) -> (i32, i32) {
    %c0_i32 = arith.constant 0 : i32
    %c0_i32_0 = arith.constant 0 : i32
    %c0_i32_1 = arith.constant 0 : i32
    return %c0_i32, %c0_i32_0 : i32, i32
  }
  func.func @transform_5(%arg0: i32) -> (i32, i32) {
    %c0_i32 = arith.constant 0 : i32
    %c0_i32_0 = arith.constant 0 : i32
    %c0_i32_1 = arith.constant 0 : i32
    return %c0_i32, %c0_i32_0 : i32, i32
  }
  func.func @transform_6(%arg0: i32) -> (i32, i32) {
    %c0_i32 = arith.constant 0 : i32
    %c0_i32_0 = arith.constant 0 : i32
    %c0_i32_1 = arith.constant 0 : i32
    return %c0_i32, %c0_i32_0 : i32, i32
  }
  func.func @transform_7(%arg0: i32) -> (i32, i32) {
    %c0_i32 = arith.constant 0 : i32
    %c0_i32_0 = arith.constant 0 : i32
    return %arg0, %c0_i32 : i32, i32
  }
}

</mosaic_0001>

<bundles_post_ra>
// kernel: srseg_forward.1
= control target key start
LH: loop header
LB: loop body
LE: loop exit
PB: predicated region body
PF: predicated region fallthrough
CT: control target
= control target key end

     0   :  { %12 = vsyncpa [#allocation3], 0  ;;  %s1649_s0 = inlined_call_operand.vmem [shape: bf16[512,8], index: 0, kind: input, shape index: {}]   ;;  %s1650_s1 = inlined_call_operand.hbm [shape: bf16[8,64], index: 1, kind: input, shape index: {}]   ;;  %s1651_s2 = inlined_call_operand.hbm [shape: f32[1,64], index: 2, kind: input, shape index: {}]   ;;  %s1652_s3 = inlined_call_operand.hbm [shape: bf16[64,128], index: 3, kind: input, shape index: {}]   ;;  %s1653_s4 = inlined_call_operand.hbm [shape: f32[1,128], index: 4, kind: input, shape index: {}]   ;;  %s1654_s5 = inlined_call_operand.hbm [shape: bf16[128,128], index: 5, kind: input, shape index: {}]   ;;  %s1655_s6 = inlined_call_operand.hbm [shape: f32[1,128], index: 6, kind: input, shape index: {}]   ;;  %s1656_s7 = inlined_call_operand.vmem [shape: bf16[512,128], index: 7, kind: output, shape index: {}]  }
   0x1   :  { %13 = vsyncpa [#allocation5], 0 }
   0x2   :  { %14 = vsyncpa [#allocation8], 0 }
   0x3   :  { %15 = vsyncpa [#allocation11], 0  ;;  %s1427_s24 = smov 0  }
   0x4 LB: > { %s1379_s25 = smov [#allocation4]   ;;  %s935_s27 = sadd.s32 4294967295, %s1377_s24   ;;  %s1377_s24 = sphi %s1427_s24, %s21_s24  }
   0x5   : > { %s228_s26 = sshll.u32 %s1379_s25, 4  ;;  %p937_p0 = scmp.ge.s32.totalorder %s1377_s24, 1  ;;  %s1441_s26 = int_to_ptr.vmem [resolvable:$true] %s228_s26 }
   0x6   : > { %p204_p1 = scmp.lt.s32.totalorder %s1377_s24, 9  ;;  %p1437_p2 = scmp.eq.s32.totalorder %s935_s27, 0 }
   0x7   : > { %s1380_s30 = smov [#allocation7]   ;;  %s1381_s9 = smov [#allocation2]  }
   0x8   : > { %s1660_s28 = scalar_select %p1437_p2, 1, 0 }
   0x9   : > { %p1443_p3 = pnand %p937_p0, %p204_p1  ;;  %s252_s8 = sshll.u32 %s1380_s30, 4  ;;  %s1449_s8 = int_to_ptr.vmem [resolvable:$true] %s252_s8 }
   0xa   : > { %s217_s10 = sshll.u32 %s1381_s9, 4  ;;  %s1382_s12 = smov [#allocation6]   ;;  %s1457_s10 = int_to_ptr.vmem [resolvable:$true] %s217_s10 }
   0xb   : > { %s1661_s29 = scalar_select %p1443_p3, 1, 0 }
   0xc   : > { %p1124_p4 = pneg %p1443_p3  ;;  %s238_s13 = sshll.u32 %s1382_s12, 4  ;;  %s1459_s13 = int_to_ptr.vmem [resolvable:$true] %s238_s13 }
   0xd   : > { %s1187_s16 = scalar_lea.hbm %s1651_s2, 16 }
   0xe   : > { %p1453_p5 = pnand %p1437_p2, %p1124_p4  ;;  %p1188_p6 = scmp.ne.s32.totalorder %s1651_s2, %s1187_s16 }
   0xf   : > { %p1194_p10 = scmp.lt.u32.totalorder %s1187_s16, %s1651_s2 }
  0x10   : > { %p1469_p7 = pneg %p1453_p5 }
  0x12   : > { %p1190_p8 = pnand %p1469_p7, %p1188_p6 }
  0x14   : > { %p1191_p9 = pneg %p1190_p8 }
  0x16   : > { %p1196_p11 = pnand %p1194_p10, %p1191_p9 }
  0x18   : > { %1199 = shalt.err (!%p1196_p11)
}
  0x19   : > { %s1200_s22 = scalar_lea.vmem %s1441_s26, 16  ;;  %s1207_s23 = scalar_lea.vmem %s1441_s26, 32 }
  0x1a   : > { %p1201_p12 = scmp.ne.s32.totalorder %s1441_s26, %s1200_s22  ;;  %p1208_p1 = scmp.lt.s32.totalorder %s1441_s26, %s1441_s26 }
  0x1b   : > { %p1209_p4 = scmp.lt.s32.totalorder %s1207_s23, %s1200_s22 }
  0x1c   : > { %p1203_p13 = pnand %p1201_p12, %p1469_p7 }
  0x1d   : > { %p1210_p6 = por %p1209_p4, %p1208_p1 }
  0x1e   : > { %p1204_p0 = pneg %p1203_p13 }
  0x20   : > { %p1211_p8 = pnand %p1210_p6, %p1204_p0 }
  0x22   : > { %1214 = shalt.err (!%p1211_p8)
}
  0x23   : > { %1130 = dma.hbm_to_vmem [thread:$0]  (!%p1453_p5), %s1651_s2, 16, %s1441_s26, [#allocation5]  }
  0x24   : > { %s1215_s14 = scalar_lea.hbm %s1653_s4, 16 }
  0x25   : > { %p1216_p9 = scmp.ne.s32.totalorder %s1653_s4, %s1215_s14  ;;  %p1222_p12 = scmp.lt.u32.totalorder %s1215_s14, %s1653_s4 }
  0x27   : > { %p1218_p10 = pnand %p1216_p9, %p1469_p7 }
  0x29   : > { %p1219_p11 = pneg %p1218_p10 }
  0x2b   : > { %p1224_p13 = pnand %p1222_p12, %p1219_p11 }
  0x2d   : > { %1227 = shalt.err (!%p1224_p13)
}
  0x2e   : > { %s1228_s26 = scalar_lea.vmem %s1449_s8, 16  ;;  %s1235_s20 = scalar_lea.vmem %s1449_s8, 32 }
  0x2f   : > { %p1229_p0 = scmp.ne.s32.totalorder %s1449_s8, %s1228_s26  ;;  %p1236_p6 = scmp.lt.s32.totalorder %s1449_s8, %s1449_s8 }
  0x30   : > { %p1237_p8 = scmp.lt.s32.totalorder %s1235_s20, %s1228_s26 }
  0x31   : > { %p1231_p1 = pnand %p1229_p0, %p1469_p7 }
  0x32   : > { %p1238_p9 = por %p1237_p8, %p1236_p6 }
  0x33   : > { %p1232_p4 = pneg %p1231_p1 }
  0x35   : > { %p1239_p10 = pnand %p1238_p9, %p1232_p4 }
  0x37   : > { %1242 = shalt.err (!%p1239_p10)
}
  0x38   : > { %1136 = dma.hbm_to_vmem [thread:$0]  (!%p1453_p5), %s1653_s4, 16, %s1449_s8, [#allocation8]  }
  0x39   : > { %s1243_s30 = scalar_lea.hbm %s1650_s1, 64 }
  0x3a   : > { %p1244_p11 = scmp.ne.s32.totalorder %s1650_s1, %s1243_s30  ;;  %p1250_p0 = scmp.lt.u32.totalorder %s1243_s30, %s1650_s1 }
  0x3c   : > { %p1246_p12 = pnand %p1244_p11, %p1469_p7 }
  0x3e   : > { %p1247_p13 = pneg %p1246_p12 }
  0x40   : > { %p1252_p1 = pnand %p1250_p0, %p1247_p13 }
  0x42   : > { %1255 = shalt.err (!%p1252_p1)
}
  0x43   : > { %s1256_s8 = scalar_lea.vmem %s1457_s10, 64  ;;  %p1264_p9 = scmp.lt.s32.totalorder %s1457_s10, %s1457_s10 }
  0x44   : > { %p1257_p4 = scmp.ne.s32.totalorder %s1457_s10, %s1256_s8  ;;  %p1265_p10 = scmp.lt.s32.totalorder %s1256_s8, %s1256_s8 }
  0x46   : > { %p1259_p6 = pnand %p1257_p4, %p1469_p7  ;;  %p1266_p11 = por %p1265_p10, %p1264_p9 }
  0x48   : > { %p1260_p8 = pneg %p1259_p6 }
  0x4a   : > { %p1267_p12 = pnand %p1266_p11, %p1260_p8 }
  0x4c   : > { %1270 = shalt.err (!%p1267_p12)
}
  0x4d   : > { %1127 = dma.hbm_to_vmem [thread:$0]  (!%p1453_p5), %s1650_s1, 64, %s1457_s10, [#allocation3]  }
  0x4e   : > { %s1271_s20 = scalar_lea.hbm %s1652_s3, 512 }
  0x4f   : > { %p1272_p13 = scmp.ne.s32.totalorder %s1652_s3, %s1271_s20  ;;  %p1278_p4 = scmp.lt.u32.totalorder %s1271_s20, %s1652_s3 }
  0x51   : > { %p1274_p0 = pnand %p1272_p13, %p1469_p7 }
  0x53   : > { %p1275_p1 = pneg %p1274_p0 }
  0x55   : > { %p1280_p6 = pnand %p1278_p4, %p1275_p1 }
  0x57   : > { %1283 = shalt.err (!%p1280_p6)
}
  0x58   : > { %s1284_s10 = scalar_lea.vmem %s1459_s13, 512  ;;  %p1292_p11 = scmp.lt.s32.totalorder %s1459_s13, %s1459_s13 }
  0x59   : > { %p1285_p8 = scmp.ne.s32.totalorder %s1459_s13, %s1284_s10  ;;  %p1293_p12 = scmp.lt.s32.totalorder %s1284_s10, %s1284_s10 }
  0x5b   : > { %p1287_p9 = pnand %p1285_p8, %p1469_p7  ;;  %p1294_p13 = por %p1293_p12, %p1292_p11 }
  0x5d   : > { %p1288_p10 = pneg %p1287_p9 }
  0x5f   : > { %p1295_p0 = pnand %p1294_p13, %p1288_p10 }
  0x61   : > { %1298 = shalt.err (!%p1295_p0)
}
  0x62   : > { %s1383_s30 = smov 64   ;;  %s1384_s9 = smov 4  }
  0x63   : > { %1133 = dma.hbm_to_vmem [thread:$0]  (!%p1453_p5), %s1652_s3, 512, %s1459_s13, [#allocation5], %s1383_s30, %s1383_s30, %s1384_s9  }
  0x64   : > { %s1385_s15 = smov [#allocation9]   ;;  %s1386_s16 = smov [#allocation10]  }
  0x65   : > { %s262_s8 = sshll.u32 %s1385_s15, 4  ;;  %s276_s17 = sshll.u32 %s1386_s16, 4  ;;  %s263_s8 = int_to_ptr.vmem [resolvable:$true] %s262_s8  ;;  %s277_s17 = int_to_ptr.vmem [resolvable:$true] %s276_s17 }
  0x66   : > { %s1299_s20 = scalar_lea.hbm %s1654_s5, 1024 }
  0x67   : > { %p1300_p1 = scmp.ne.s32.totalorder %s1654_s5, %s1299_s20  ;;  %p1306_p8 = scmp.lt.u32.totalorder %s1299_s20, %s1654_s5 }
  0x69   : > { %p1302_p4 = pnand %p1300_p1, %p1469_p7 }
  0x6b   : > { %p1303_p6 = pneg %p1302_p4 }
  0x6d   : > { %p1308_p9 = pnand %p1306_p8, %p1303_p6 }
  0x6f   : > { %1311 = shalt.err (!%p1308_p9)
}
  0x70   : > { %s1312_s13 = scalar_lea.vmem %s263_s8, 1024  ;;  %p1320_p13 = scmp.lt.s32.totalorder %s263_s8, %s263_s8 }
  0x71   : > { %p1313_p10 = scmp.ne.s32.totalorder %s263_s8, %s1312_s13  ;;  %p1321_p0 = scmp.lt.s32.totalorder %s1312_s13, %s1312_s13 }
  0x73   : > { %p1315_p11 = pnand %p1313_p10, %p1469_p7  ;;  %p1322_p2 = por %p1321_p0, %p1320_p13 }
  0x75   : > { %p1316_p12 = pneg %p1315_p11 }
  0x77   : > { %p1323_p3 = pnand %p1322_p2, %p1316_p12 }
  0x79   : > { %1326 = shalt.err (!%p1323_p3)
}
  0x7a   : > { %1139 = dma.hbm_to_vmem [thread:$0]  (!%p1453_p5), %s1654_s5, 1024, %s263_s8, [#allocation8], %s1383_s30, %s1383_s30, %s1384_s9  }
  0x7b   : > { %s1327_s16 = scalar_lea.hbm %s1655_s6, 16 }
  0x7c   : > { %p1328_p1 = scmp.ne.s32.totalorder %s1655_s6, %s1327_s16  ;;  %p1334_p3 = scmp.lt.u32.totalorder %s1327_s16, %s1655_s6 }
  0x7e   : > { %p1330_p4 = pnand %p1328_p1, %p1469_p7 }
  0x80   : > { %p1331_p2 = pneg %p1330_p4 }
  0x82   : > { %p1336_p6 = pnand %p1334_p3, %p1331_p2 }
  0x84   : > { %1339 = shalt.err (!%p1336_p6)
}
  0x85   : > { %s1340_s22 = scalar_lea.vmem %s277_s17, 16  ;;  %s1347_s30 = scalar_lea.vmem %s277_s17, 32 }
  0x86   : > { %p1341_p8 = scmp.ne.s32.totalorder %s277_s17, %s1340_s22  ;;  %p1348_p11 = scmp.lt.s32.totalorder %s277_s17, %s277_s17 }
  0x87   : > { %p1349_p12 = scmp.lt.s32.totalorder %s1347_s30, %s1340_s22 }
  0x88   : > { %p1343_p9 = pnand %p1341_p8, %p1469_p7 }
  0x89   : > { %p1350_p13 = por %p1349_p12, %p1348_p11 }
  0x8a   : > { %p1344_p10 = pneg %p1343_p9 }
  0x8c   : > { %p1351_p0 = pnand %p1350_p13, %p1344_p10 }
  0x8e   : > { %1354 = shalt.err (!%p1351_p0)
}
  0x8f   : > { %1142 = dma.hbm_to_vmem [thread:$0]  (!%p1453_p5), %s1655_s6, 16, %s277_s17, [#allocation11]  }
  0x90   : > { %p1664_p1 = scmp.ne.s32.totalorder %s1661_s29, 0 }
  0x91   : > { %p1665_p4 = scmp.ne.s32.totalorder (!%p1664_p1), %s1660_s28, 0 }
  0x92   : > { %298 = sbr.rel (%p1664_p1) target bundleno = 843 (0x34b), region = 48 }
  0x99   : > { %1360 = dma.done.wait (%p1665_p4), [#allocation3], 64  }
  0x9a   : > { %1362 = vsyncadd (%p1665_p4), [#allocation3], 4294967232 }
  0x9b   : > { %1364 = dma.done.wait (%p1665_p4), [#allocation5], 528  }
  0x9c   : > { %1366 = vsyncadd (%p1665_p4), [#allocation5], 4294966768 }
  0x9d   : > { %1368 = dma.done.wait (%p1665_p4), [#allocation8], 1040  }
  0x9e   : > { %1370 = vsyncadd (%p1665_p4), [#allocation8], 4294966256 }
  0x9f   : > { %1372 = dma.done.wait (%p1665_p4), [#allocation11], 16  }
  0xa0   : > { %1374 = vsyncadd (%p1665_p4), [#allocation11], 4294967280  ;;  %s952_s29 = sshll.u32 %s935_s27, 3  ;;  %vm412_vm0 = vcmask 1043456   ;;  %vm399_vm1 = vcmask 64512   ;;  %v1175_v5 = vld [vmem:[#allocation6] sm:$0xff]  }
  0xa1   : > { %p351_p5 = scmp.lt.s32.totalorder %s952_s29, 63  ;;  %v371_v0 = vld [vmem:[#allocation2] sm:$0xf]  ;;  %v1176_v6 = vld [vmem:[#allocation6 + $0x8] sm:$0xff]   ;;  %v1177_v8 = vld [vmem:[#allocation6 + $0x10] sm:$0xff]   ;;  %vm532_vm2 = vcmask 523264  }
  0xa2   : > { %1099 = vmatprep.subr.msk.bf16.mxu1 %vm412_vm0, %v371_v0  ;;  %v414_v1 = vsel %vm412_vm0, %v371_v0, 0  ;;  %v1178_v9 = vld [vmem:[#allocation6 + $0x18] sm:$0xff]   ;;  %v1179_v10 = vld [vmem:[#allocation9] sm:$0xff]   ;;  %v1180_v11 = vld [vmem:[#allocation9 + $0x8] sm:$0xff]  }
  0xa3   : > { %s1667_s29 = smov (!%p351_p5, %s952_s29), 63  ;;  %1050 = vmatpush3.bf16.msra.mxu1 %v414_v1  ;;  %1075 = vmatprep.subr.bf16.mxu0 %v1179_v10  ;;  %v1181_v12 = vld [vmem:[#allocation9 + $0x10] sm:$0xff]   ;;  %v1182_v13 = vld [vmem:[#allocation9 + $0x18] sm:$0xff]   ;;  %v1183_v14 = vld [vmem:[#allocation9 + $0x20] sm:$0xff]  }
  0xa4   : > { %s953_s11 = sshll.u32 %s1667_s29, 2  ;;  %1059 = vmatprep.subr.bf16.mxu1 %v1175_v5  ;;  %1076 = vmatpush3.bf16.msra.mxu0 %v1179_v10  ;;  %v1184_v15 = vld [vmem:[#allocation9 + $0x28] sm:$0xff]   ;;  %v956_v16 = vld [vmem:[#allocation4] ss:$0 sm:$0xff]  ;;  %v1185_v45 = vld [vmem:[#allocation9 + $0x30] sm:$0xff]  }
  0xa5   : > { %s354_s23 = scalar_lea.vmem %s1649_s0, %s953_s11  ;;  %1077 = vmatprep.subr.bf16.mxu0 %v1180_v11  ;;  %v1186_v46 = vld [vmem:[#allocation9 + $0x38] sm:$0xff]   ;;  %s360_s25 = scalar_lea.vmem %s1656_s7, %s953_s11 }
  0xa6   : > { %v1171_v2 = vld [vmem:[%s354_s23] sm:$0xff]   ;;  %v1172_v3 = vld [vmem:[%s354_s23 + $0x8] sm:$0xff]   ;;  %v1173_v4 = vld [vmem:[%s354_s23 + $0x10] sm:$0xff]  }
  0xa7   : > { %1051 = vmatprep.mubr.msk.bf16.mxu1 %vm399_vm1, %v1171_v2  ;;  %v1174_v7 = vld [vmem:[%s354_s23 + $0x18] sm:$0xff]   ;;  %v965_v47 = vld [vmem:[#allocation7] ss:$0 sm:$0xff] }
  0xa8   : > { %1052 = vmatmul.mubr.msk.bf16.vlgmr.msra.gmra.mrb[0].mxu1 %vm399_vm1, %v1172_v3  ;;  %1078 = vmatpush3.bf16.msra.mxu0 %v1180_v11 }
  0xa9   : > { %1055 = vmatprep.mubr.msk.bf16.mxu1 %vm399_vm1, %v1173_v4  ;;  %1060 = vmatpush3.bf16.msra.mxu1 %v1175_v5 }
  0xaa   : > { %1061 = vmatprep.subr.bf16.mxu1 %v1176_v6  ;;  %1079 = vmatprep.subr.bf16.mxu0 %v1181_v12 }
  0xac   : > { %1080 = vmatpush3.bf16.msra.mxu0 %v1181_v12  ;;  %v758_v12 = vlaneseq }
  0xad   : > { %1062 = vmatpush3.bf16.msra.mxu1 %v1176_v6  ;;  %1081 = vmatprep.subr.bf16.mxu0 %v1182_v13 }
  0xae   : > { %1063 = vmatprep.subr.bf16.mxu1 %v1177_v8 }
  0xb0   : > { %1056 = vmatmul.mubr.msk.bf16.gmra.mrb[4].mxu1 %vm399_vm1, %v1174_v7  ;;  %1082 = vmatpush3.bf16.msra.mxu0 %v1182_v13  ;;  %v974_v13 = vld [vmem:[#allocation10] ss:$0 sm:$0xff] }
  0xb1   : > { %1064 = vmatpush3.bf16.msra.mxu1 %v1177_v8  ;;  %1083 = vmatprep.subr.bf16.mxu0 %v1183_v14 }
  0xb2   : > { %1065 = vmatprep.subr.bf16.mxu1 %v1178_v9 }
  0xb4   : > { %1084 = vmatpush3.bf16.msra.mxu0 %v1183_v14 }
  0xb5   : > { %1066 = vmatpush3.bf16.msra.mxu1 %v1178_v9  ;;  %1085 = vmatprep.subr.bf16.mxu0 %v1184_v15 }
  0xb8   : > { %1086 = vmatpush3.bf16.msra.mxu0 %v1184_v15  ;;  %v759_v15 = vand.u32 127, %v758_v12 }
  0xb9   : > { %1087 = vmatprep.subr.bf16.mxu0 %v1185_v45 }
  0xba   : > { %vm760_vm3 = vcmp.ge.s32.totalorder %v759_v15, 60 }
  0xbc   : > { %1088 = vmatpush3.bf16.msra.mxu0 %v1185_v45 }
  0xbd   : > { %1089 = vmatprep.subr.bf16.mxu0 %v1186_v46 }
  0xc0   : > { %1090 = vmatpush3.bf16.msra.mxu0 %v1186_v46 }
 0x17b   : > { %v1053_v17 = vpop.f32.mrb[0].mxu1 }
 0x17c   : > { %v459_v18 = vadd.f32 %v1053_v17, %v956_v16  ;;  %v450_v19 = vpop.f32.mrb[1].mxu1 }
 0x17d   : > { %v451_v20 = vadd.f32 %v956_v16, %v450_v19  ;;  %v1054_v21 = vpop.f32.mrb[2].mxu1 }
 0x17e   : > { %v462_v22 = vadd.f32 %v1054_v21, %v956_v16  ;;  %v453_v23 = vpop.f32.mrb[3].mxu1  ;;  %v483_v25 = vmax.f32 %v459_v18, 0.0 }
 0x17f   : > { %v454_v24 = vadd.f32 %v956_v16, %v453_v23  ;;  %v481_v27 = vmax.f32 %v451_v20, 0.0 }
 0x180   : > { %v484_v26 = vmax.f32 %v462_v22, 0.0 }
 0x181   : > { %v482_v28 = vmax.f32 %v454_v24, 0.0 }
 0x182   : > { %v490_v29 = vpack.c.bf16 %v484_v26, %v483_v25 }
 0x183   : > { %v489_v30 = vpack.c.bf16 %v482_v28, %v481_v27  ;;  %v1057_v31 = vpop.f32.mrb[4].mxu1 }
 0x184   : > { %v475_v32 = vadd.f32 %v1057_v31, %v956_v16  ;;  %v466_v33 = vpop.f32.mrb[5].mxu1 }
 0x185   : > { %v467_v34 = vadd.f32 %v956_v16, %v466_v33  ;;  %v1058_v35 = vpop.f32.mrb[6].mxu1  ;;  %1067 = vmatprep.mubr.msk.bf16.mxu1 %vm532_vm2, %v489_v30 }
 0x186   : > { %v478_v36 = vadd.f32 %v1058_v35, %v956_v16  ;;  %v469_v37 = vpop.f32.mrb[7].mxu1  ;;  %1068 = vmatmul.mubr.msk.bf16.vlgmr.msra.gmra.mrb[8].mxu1 %vm532_vm2, %v490_v29  ;;  %v487_v39 = vmax.f32 %v475_v32, 0.0 }
 0x187   : > { %v470_v38 = vadd.f32 %v956_v16, %v469_v37  ;;  %v485_v41 = vmax.f32 %v467_v34, 0.0 }
 0x188   : > { %v488_v40 = vmax.f32 %v478_v36, 0.0 }
 0x189   : > { %v486_v42 = vmax.f32 %v470_v38, 0.0 }
 0x18a   : > { %v492_v43 = vpack.c.bf16 %v488_v40, %v487_v39 }
 0x18b   : > { %v491_v44 = vpack.c.bf16 %v486_v42, %v485_v41 }
 0x18d   : > { %1071 = vmatprep.mubr.msk.bf16.mxu1 %vm532_vm2, %v491_v44 }
 0x18e   : > { %1072 = vmatmul.mubr.msk.bf16.gmra.mrb[12].mxu1 %vm532_vm2, %v492_v43 }
 0x259   : > { %v1069_v48 = vpop.f32.mrb[8].mxu1 }
 0x25a   : > { %v588_v49 = vadd.f32 %v1069_v48, %v965_v47  ;;  %v579_v50 = vpop.f32.mrb[9].mxu1 }
 0x25b   : > { %v580_v51 = vadd.f32 %v965_v47, %v579_v50  ;;  %v1070_v52 = vpop.f32.mrb[10].mxu1 }
 0x25c   : > { %v591_v53 = vadd.f32 %v1070_v52, %v965_v47  ;;  %v582_v54 = vpop.f32.mrb[11].mxu1  ;;  %v612_v56 = vmax.f32 %v588_v49, 0.0 }
 0x25d   : > { %v583_v55 = vadd.f32 %v965_v47, %v582_v54  ;;  %v610_v58 = vmax.f32 %v580_v51, 0.0 }
 0x25e   : > { %v613_v57 = vmax.f32 %v591_v53, 0.0 }
 0x25f   : > { %v611_v59 = vmax.f32 %v583_v55, 0.0 }
 0x260   : > { %v619_v60 = vpack.c.bf16 %v613_v57, %v612_v56 }
 0x261   : > { %v1073_v61 = vpop.f32.mrb[12].mxu1  ;;  %v618_v62 = vpack.c.bf16 %v611_v59, %v610_v58 }
 0x262   : > { %v604_v63 = vadd.f32 %v1073_v61, %v965_v47  ;;  %v595_v0 = vpop.f32.mrb[13].mxu1 }
 0x263   : > { %v596_v1 = vadd.f32 %v965_v47, %v595_v0  ;;  %v1074_v2 = vpop.f32.mrb[14].mxu1  ;;  %1091 = vmatprep.mubr.bf16.mxu0 %v618_v62 }
 0x264   : > { %v607_v3 = vadd.f32 %v1074_v2, %v965_v47  ;;  %v598_v4 = vpop.f32.mrb[15].mxu1  ;;  %1092 = vmatmul.mubr.bf16.vlgmr.msra.gmra.mrb[0].mxu0 %v619_v60  ;;  %v616_v6 = vmax.f32 %v604_v63, 0.0 }
 0x265   : > { %v599_v5 = vadd.f32 %v965_v47, %v598_v4  ;;  %v614_v8 = vmax.f32 %v596_v1, 0.0 }
 0x266   : > { %v617_v7 = vmax.f32 %v607_v3, 0.0 }
 0x267   : > { %v615_v9 = vmax.f32 %v599_v5, 0.0 }
 0x268   : > { %v621_v10 = vpack.c.bf16 %v617_v7, %v616_v6 }
 0x269   : > { %v620_v11 = vpack.c.bf16 %v615_v9, %v614_v8 }
 0x26b   : > { %1095 = vmatprep.mubr.bf16.mxu0 %v620_v11 }
 0x26c   : > { %1096 = vmatmul.mubr.bf16.gmra.mrb[4].mxu0 %v621_v10 }
 0x337   : > { %v1093_v14 = vpop.f32.mrb[0].mxu0 }
 0x338   : > { %v736_v16 = vadd.f32 %v1093_v14, %v974_v13  ;;  %v727_v17 = vpop.f32.mrb[1].mxu0 }
 0x339   : > { %v728_v18 = vadd.f32 %v974_v13, %v727_v17  ;;  %v1094_v19 = vpop.f32.mrb[2].mxu0 }
 0x33a   : > { %v763_v20 = vmax.f32 %v736_v16, 0.0  ;;  %v739_v21 = vadd.f32 %v1094_v19, %v974_v13  ;;  %v730_v22 = vpop.f32.mrb[3].mxu0 }
 0x33b   : > { %v761_v23 = vmax.f32 %v728_v18, 0.0  ;;  %v731_v24 = vadd.f32 %v974_v13, %v730_v22 }
 0x33c   : > { %v764_v25 = vmax.f32 %v739_v21, 0.0  ;;  %v773_v27 = vsel %vm760_vm3, %v763_v20, %v736_v16 }
 0x33d   : > { %v762_v26 = vmax.f32 %v731_v24, 0.0  ;;  %v771_v29 = vsel %vm760_vm3, %v761_v23, %v728_v18 }
 0x33e   : > { %v774_v28 = vsel %vm760_vm3, %v764_v25, %v739_v21 }
 0x33f   : > { %v1009_v30 = vpack.c.bf16 %v774_v28, %v773_v27  ;;  %v772_v31 = vsel %vm760_vm3, %v762_v26, %v731_v24  ;;  %v1097_v32 = vpop.f32.mrb[4].mxu0 }
 0x340   : > { %v1004_v33 = vpack.c.bf16 %v772_v31, %v771_v29  ;;  %v752_v34 = vadd.f32 %v1097_v32, %v974_v13  ;;  %v743_v35 = vpop.f32.mrb[5].mxu0 }
 0x341   : > { %1021 = vst [vmem:[%s360_s25 + $0x8] sm:$0xff] %v1009_v30   ;;  %v744_v36 = vadd.f32 %v974_v13, %v743_v35  ;;  %v1098_v37 = vpop.f32.mrb[6].mxu0 }
 0x342   : > { %1005 = vst [vmem:[%s360_s25] sm:$0xff] %v1004_v33   ;;  %v767_v38 = vmax.f32 %v752_v34, 0.0  ;;  %v755_v39 = vadd.f32 %v1098_v37, %v974_v13  ;;  %v746_v40 = vpop.f32.mrb[7].mxu0 }
 0x343   : > { %v765_v41 = vmax.f32 %v744_v36, 0.0  ;;  %v747_v42 = vadd.f32 %v974_v13, %v746_v40 }
 0x344   : > { %v768_v43 = vmax.f32 %v755_v39, 0.0  ;;  %v777_v45 = vsel %vm760_vm3, %v767_v38, %v752_v34 }
 0x345   : > { %v766_v44 = vmax.f32 %v747_v42, 0.0  ;;  %v775_v47 = vsel %vm760_vm3, %v765_v41, %v744_v36 }
 0x346   : > { %v778_v46 = vsel %vm760_vm3, %v768_v43, %v755_v39 }
 0x347   : > { %v1019_v48 = vpack.c.bf16 %v778_v46, %v777_v45  ;;  %v776_v49 = vsel %vm760_vm3, %v766_v44, %v747_v42 }
 0x348   : > { %v1014_v50 = vpack.c.bf16 %v776_v49, %v775_v47 }
 0x349   : > { %1023 = vst [vmem:[%s360_s25 + $0x18] sm:$0xff] %v1019_v48  }
 0x34a   : > { %1022 = vst [vmem:[%s360_s25 + $0x10] sm:$0xff] %v1014_v50  }
 0x34b PF: > { %s21_s24 = sadd.s32 1, %s1377_s24  }
 0x34c   : > { %p18_p7 = scmp.ge.s32.totalorder %s21_s24, 10  }
 0x34e   :  { %20 = sbr.rel (!%p18_p7) target bundleno = 4 (0x4), region = 103 }
 0x355   :  { %841 = vsyncpa [#allocation3], 1 }
 0x356   :  { %843 = vsyncpa [#allocation3 + $0x1], 1 }
 0x357   :  { %844 = vsyncpa [#allocation5], 1 }
 0x358   :  { %845 = vsyncpa [#allocation8], 1 }
 0x359   :  { %846 = vsyncpa [#allocation11], 1 }

// kernel: srseg_forward.1
= control target key start
LH: loop header
LB: loop body
LE: loop exit
PB: predicated region body
PF: predicated region fallthrough
CT: control target
= control target key end

     0   :  { %12 = vsyncpa [#allocation3], 0  ;;  %s1649_s0 = inlined_call_operand.vmem [shape: bf16[512,8], index: 0, kind: input, shape index: {}]   ;;  %s1650_s1 = inlined_call_operand.hbm [shape: bf16[8,64], index: 1, kind: input, shape index: {}]   ;;  %s1651_s2 = inlined_call_operand.hbm [shape: f32[1,64], index: 2, kind: input, shape index: {}]   ;;  %s1652_s3 = inlined_call_operand.hbm [shape: bf16[64,128], index: 3, kind: input, shape index: {}]   ;;  %s1653_s4 = inlined_call_operand.hbm [shape: f32[1,128], index: 4, kind: input, shape index: {}]   ;;  %s1654_s5 = inlined_call_operand.hbm [shape: bf16[128,128], index: 5, kind: input, shape index: {}]   ;;  %s1655_s6 = inlined_call_operand.hbm [shape: f32[1,128], index: 6, kind: input, shape index: {}]   ;;  %s1656_s7 = inlined_call_operand.vmem [shape: bf16[512,128], index: 7, kind: output, shape index: {}]  }
   0x1   :  { %13 = vsyncpa [#allocation5], 0 }
   0x2   :  { %14 = vsyncpa [#allocation8], 0 }
   0x3   :  { %15 = vsyncpa [#allocation11], 0  ;;  %s1427_s24 = smov 0  }
   0x4 LB: > { %s1379_s25 = smov [#allocation4]   ;;  %s935_s27 = sadd.s32 4294967295, %s1377_s24   ;;  %s1377_s24 = sphi %s1427_s24, %s21_s24  }
   0x5   : > { %s228_s26 = sshll.u32 %s1379_s25, 4  ;;  %p937_p0 = scmp.ge.s32.totalorder %s1377_s24, 1  ;;  %s1441_s26 = int_to_ptr.vmem [resolvable:$true] %s228_s26 }
   0x6   : > { %p204_p1 = scmp.lt.s32.totalorder %s1377_s24, 9  ;;  %p1437_p2 = scmp.eq.s32.totalorder %s935_s27, 0 }
   0x7   : > { %s1380_s30 = smov [#allocation7]   ;;  %s1381_s9 = smov [#allocation2]  }
   0x8   : > { %s1660_s28 = scalar_select %p1437_p2, 1, 0 }
   0x9   : > { %p1443_p3 = pnand %p937_p0, %p204_p1  ;;  %s252_s8 = sshll.u32 %s1380_s30, 4  ;;  %s1449_s8 = int_to_ptr.vmem [resolvable:$true] %s252_s8 }
   0xa   : > { %s217_s10 = sshll.u32 %s1381_s9, 4  ;;  %s1382_s12 = smov [#allocation6]   ;;  %s1457_s10 = int_to_ptr.vmem [resolvable:$true] %s217_s10 }
   0xb   : > { %s1661_s29 = scalar_select %p1443_p3, 1, 0 }
   0xc   : > { %p1124_p4 = pneg %p1443_p3  ;;  %s238_s13 = sshll.u32 %s1382_s12, 4  ;;  %s1459_s13 = int_to_ptr.vmem [resolvable:$true] %s238_s13 }
   0xd   : > { %s1187_s16 = scalar_lea.hbm %s1651_s2, 16 }
   0xe   : > { %p1453_p5 = pnand %p1437_p2, %p1124_p4  ;;  %p1188_p6 = scmp.ne.s32.totalorder %s1651_s2, %s1187_s16 }
   0xf   : > { %p1194_p10 = scmp.lt.u32.totalorder %s1187_s16, %s1651_s2 }
  0x10   : > { %p1469_p7 = pneg %p1453_p5 }
  0x12   : > { %p1190_p8 = pnand %p1469_p7, %p1188_p6 }
  0x14   : > { %p1191_p9 = pneg %p1190_p8 }
  0x16   : > { %p1196_p11 = pnand %p1194_p10, %p1191_p9 }
  0x18   : > { %1199 = shalt.err (!%p1196_p11)
}
  0x19   : > { %s1200_s22 = scalar_lea.vmem %s1441_s26, 16  ;;  %s1207_s23 = scalar_lea.vmem %s1441_s26, 32 }
  0x1a   : > { %p1201_p12 = scmp.ne.s32.totalorder %s1441_s26, %s1200_s22  ;;  %p1208_p1 = scmp.lt.s32.totalorder %s1441_s26, %s1441_s26 }
  0x1b   : > { %p1209_p4 = scmp.lt.s32.totalorder %s1207_s23, %s1200_s22 }
  0x1c   : > { %p1203_p13 = pnand %p1201_p12, %p1469_p7 }
  0x1d   : > { %p1210_p6 = por %p1209_p4, %p1208_p1 }
  0x1e   : > { %p1204_p0 = pneg %p1203_p13 }
  0x20   : > { %p1211_p8 = pnand %p1210_p6, %p1204_p0 }
  0x22   : > { %1214 = shalt.err (!%p1211_p8)
}
  0x23   : > { %1130 = dma.hbm_to_vmem [thread:$0]  (!%p1453_p5), %s1651_s2, 16, %s1441_s26, [#allocation5]  }
  0x24   : > { %s1215_s14 = scalar_lea.hbm %s1653_s4, 16 }
  0x25   : > { %p1216_p9 = scmp.ne.s32.totalorder %s1653_s4, %s1215_s14  ;;  %p1222_p12 = scmp.lt.u32.totalorder %s1215_s14, %s1653_s4 }
  0x27   : > { %p1218_p10 = pnand %p1216_p9, %p1469_p7 }
  0x29   : > { %p1219_p11 = pneg %p1218_p10 }
  0x2b   : > { %p1224_p13 = pnand %p1222_p12, %p1219_p11 }
  0x2d   : > { %1227 = shalt.err (!%p1224_p13)
}
  0x2e   : > { %s1228_s26 = scalar_lea.vmem %s1449_s8, 16  ;;  %s1235_s20 = scalar_lea.vmem %s1449_s8, 32 }
  0x2f   : > { %p1229_p0 = scmp.ne.s32.totalorder %s1449_s8, %s1228_s26  ;;  %p1236_p6 = scmp.lt.s32.totalorder %s1449_s8, %s1449_s8 }
  0x30   : > { %p1237_p8 = scmp.lt.s32.totalorder %s1235_s20, %s1228_s26 }
  0x31   : > { %p1231_p1 = pnand %p1229_p0, %p1469_p7 }
  0x32   : > { %p1238_p9 = por %p1237_p8, %p1236_p6 }
  0x33   : > { %p1232_p4 = pneg %p1231_p1 }
  0x35   : > { %p1239_p10 = pnand %p1238_p9, %p1232_p4 }
  0x37   : > { %1242 = shalt.err (!%p1239_p10)
}
  0x38   : > { %1136 = dma.hbm_to_vmem [thread:$0]  (!%p1453_p5), %s1653_s4, 16, %s1449_s8, [#allocation8]  }
  0x39   : > { %s1243_s30 = scalar_lea.hbm %s1650_s1, 64 }
  0x3a   : > { %p1244_p11 = scmp.ne.s32.totalorder %s1650_s1, %s1243_s30  ;;  %p1250_p0 = scmp.lt.u32.totalorder %s1243_s30, %s1650_s1 }
  0x3c   : > { %p1246_p12 = pnand %p1244_p11, %p1469_p7 }
  0x3e   : > { %p1247_p13 = pneg %p1246_p12 }
  0x40   : > { %p1252_p1 = pnand %p1250_p0, %p1247_p13 }
  0x42   : > { %1255 = shalt.err (!%p1252_p1)
}
  0x43   : > { %s1256_s8 = scalar_lea.vmem %s1457_s10, 64  ;;  %p1264_p9 = scmp.lt.s32.totalorder %s1457_s10, %s1457_s10 }
  0x44   : > { %p1257_p4 = scmp.ne.s32.totalorder %s1457_s10, %s1256_s8  ;;  %p1265_p10 = scmp.lt.s32.totalorder %s1256_s8, %s1256_s8 }
  0x46   : > { %p1259_p6 = pnand %p1257_p4, %p1469_p7  ;;  %p1266_p11 = por %p1265_p10, %p1264_p9 }
  0x48   : > { %p1260_p8 = pneg %p1259_p6 }
  0x4a   : > { %p1267_p12 = pnand %p1266_p11, %p1260_p8 }
  0x4c   : > { %1270 = shalt.err (!%p1267_p12)
}
  0x4d   : > { %1127 = dma.hbm_to_vmem [thread:$0]  (!%p1453_p5), %s1650_s1, 64, %s1457_s10, [#allocation3]  }
  0x4e   : > { %s1271_s20 = scalar_lea.hbm %s1652_s3, 512 }
  0x4f   : > { %p1272_p13 = scmp.ne.s32.totalorder %s1652_s3, %s1271_s20  ;;  %p1278_p4 = scmp.lt.u32.totalorder %s1271_s20, %s1652_s3 }
  0x51   : > { %p1274_p0 = pnand %p1272_p13, %p1469_p7 }
  0x53   : > { %p1275_p1 = pneg %p1274_p0 }
  0x55   : > { %p1280_p6 = pnand %p1278_p4, %p1275_p1 }
  0x57   : > { %1283 = shalt.err (!%p1280_p6)
}
  0x58   : > { %s1284_s10 = scalar_lea.vmem %s1459_s13, 512  ;;  %p1292_p11 = scmp.lt.s32.totalorder %s1459_s13, %s1459_s13 }
  0x59   : > { %p1285_p8 = scmp.ne.s32.totalorder %s1459_s13, %s1284_s10  ;;  %p1293_p12 = scmp.lt.s32.totalorder %s1284_s10, %s1284_s10 }
  0x5b   : > { %p1287_p9 = pnand %p1285_p8, %p1469_p7  ;;  %p1294_p13 = por %p1293_p12, %p1292_p11 }
  0x5d   : > { %p1288_p10 = pneg %p1287_p9 }
  0x5f   : > { %p1295_p0 = pnand %p1294_p13, %p1288_p10 }
  0x61   : > { %1298 = shalt.err (!%p1295_p0)
}
  0x62   : > { %s1383_s30 = smov 64   ;;  %s1384_s9 = smov 4  }
  0x63   : > { %1133 = dma.hbm_to_vmem [thread:$0]  (!%p1453_p5), %s1652_s3, 512, %s1459_s13, [#allocation5], %s1383_s30, %s1383_s30, %s1384_s9  }
  0x64   : > { %s1385_s15 = smov [#allocation9]   ;;  %s1386_s16 = smov [#allocation10]  }
  0x65   : > { %s262_s8 = sshll.u32 %s1385_s15, 4  ;;  %s276_s17 = sshll.u32 %s1386_s16, 4  ;;  %s263_s8 = int_to_ptr.vmem [resolvable:$true] %s262_s8  ;;  %s277_s17 = int_to_ptr.vmem [resolvable:$true] %s276_s17 }
  0x66   : > { %s1299_s20 = scalar_lea.hbm %s1654_s5, 1024 }
  0x67   : > { %p1300_p1 = scmp.ne.s32.totalorder %s1654_s5, %s1299_s20  ;;  %p1306_p8 = scmp.lt.u32.totalorder %s1299_s20, %s1654_s5 }
  0x69   : > { %p1302_p4 = pnand %p1300_p1, %p1469_p7 }
  0x6b   : > { %p1303_p6 = pneg %p1302_p4 }
  0x6d   : > { %p1308_p9 = pnand %p1306_p8, %p1303_p6 }
  0x6f   : > { %1311 = shalt.err (!%p1308_p9)
}
  0x70   : > { %s1312_s13 = scalar_lea.vmem %s263_s8, 1024  ;;  %p1320_p13 = scmp.lt.s32.totalorder %s263_s8, %s263_s8 }
  0x71   : > { %p1313_p10 = scmp.ne.s32.totalorder %s263_s8, %s1312_s13  ;;  %p1321_p0 = scmp.lt.s32.totalorder %s1312_s13, %s1312_s13 }
  0x73   : > { %p1315_p11 = pnand %p1313_p10, %p1469_p7  ;;  %p1322_p2 = por %p1321_p0, %p1320_p13 }
  0x75   : > { %p1316_p12 = pneg %p1315_p11 }
  0x77   : > { %p1323_p3 = pnand %p1322_p2, %p1316_p12 }
  0x79   : > { %1326 = shalt.err (!%p1323_p3)
}
  0x7a   : > { %1139 = dma.hbm_to_vmem [thread:$0]  (!%p1453_p5), %s1654_s5, 1024, %s263_s8, [#allocation8], %s1383_s30, %s1383_s30, %s1384_s9  }
  0x7b   : > { %s1327_s16 = scalar_lea.hbm %s1655_s6, 16 }
  0x7c   : > { %p1328_p1 = scmp.ne.s32.totalorder %s1655_s6, %s1327_s16  ;;  %p1334_p3 = scmp.lt.u32.totalorder %s1327_s16, %s1655_s6 }
  0x7e   : > { %p1330_p4 = pnand %p1328_p1, %p1469_p7 }
  0x80   : > { %p1331_p2 = pneg %p1330_p4 }
  0x82   : > { %p1336_p6 = pnand %p1334_p3, %p1331_p2 }
  0x84   : > { %1339 = shalt.err (!%p1336_p6)
}
  0x85   : > { %s1340_s22 = scalar_lea.vmem %s277_s17, 16  ;;  %s1347_s30 = scalar_lea.vmem %s277_s17, 32 }
  0x86   : > { %p1341_p8 = scmp.ne.s32.totalorder %s277_s17, %s1340_s22  ;;  %p1348_p11 = scmp.lt.s32.totalorder %s277_s17, %s277_s17 }
  0x87   : > { %p1349_p12 = scmp.lt.s32.totalorder %s1347_s30, %s1340_s22 }
  0x88   : > { %p1343_p9 = pnand %p1341_p8, %p1469_p7 }
  0x89   : > { %p1350_p13 = por %p1349_p12, %p1348_p11 }
  0x8a   : > { %p1344_p10 = pneg %p1343_p9 }
  0x8c   : > { %p1351_p0 = pnand %p1350_p13, %p1344_p10 }
  0x8e   : > { %1354 = shalt.err (!%p1351_p0)
}
  0x8f   : > { %1142 = dma.hbm_to_vmem [thread:$0]  (!%p1453_p5), %s1655_s6, 16, %s277_s17, [#allocation11]  }
  0x90   : > { %p1664_p1 = scmp.ne.s32.totalorder %s1661_s29, 0 }
  0x91   : > { %p1665_p4 = scmp.ne.s32.totalorder (!%p1664_p1), %s1660_s28, 0 }
  0x92   : > { %298 = sbr.rel (%p1664_p1) target bundleno = 843 (0x34b), region = 48 }
  0x99   : > { %1360 = dma.done.wait (%p1665_p4), [#allocation3], 64  }
  0x9a   : > { %1362 = vsyncadd (%p1665_p4), [#allocation3], 4294967232 }
  0x9b   : > { %1364 = dma.done.wait (%p1665_p4), [#allocation5], 528  }
  0x9c   : > { %1366 = vsyncadd (%p1665_p4), [#allocation5], 4294966768 }
  0x9d   : > { %1368 = dma.done.wait (%p1665_p4), [#allocation8], 1040  }
  0x9e   : > { %1370 = vsyncadd (%p1665_p4), [#allocation8], 4294966256 }
  0x9f   : > { %1372 = dma.done.wait (%p1665_p4), [#allocation11], 16  }
  0xa0   : > { %1374 = vsyncadd (%p1665_p4), [#allocation11], 4294967280  ;;  %s952_s29 = sshll.u32 %s935_s27, 3  ;;  %vm412_vm0 = vcmask 1043456   ;;  %vm399_vm1 = vcmask 64512   ;;  %v1175_v5 = vld [vmem:[#allocation6] sm:$0xff]  }
  0xa1   : > { %p351_p5 = scmp.lt.s32.totalorder %s952_s29, 63  ;;  %v371_v0 = vld [vmem:[#allocation2] sm:$0xf]  ;;  %v1176_v6 = vld [vmem:[#allocation6 + $0x8] sm:$0xff]   ;;  %v1177_v8 = vld [vmem:[#allocation6 + $0x10] sm:$0xff]   ;;  %vm532_vm2 = vcmask 523264  }
  0xa2   : > { %1099 = vmatprep.subr.msk.bf16.mxu1 %vm412_vm0, %v371_v0  ;;  %v414_v1 = vsel %vm412_vm0, %v371_v0, 0  ;;  %v1178_v9 = vld [vmem:[#allocation6 + $0x18] sm:$0xff]   ;;  %v1179_v10 = vld [vmem:[#allocation9] sm:$0xff]   ;;  %v1180_v11 = vld [vmem:[#allocation9 + $0x8] sm:$0xff]  }
  0xa3   : > { %s1667_s29 = smov (!%p351_p5, %s952_s29), 63  ;;  %1050 = vmatpush3.bf16.msra.mxu1 %v414_v1  ;;  %1075 = vmatprep.subr.bf16.mxu0 %v1179_v10  ;;  %v1181_v12 = vld [vmem:[#allocation9 + $0x10] sm:$0xff]   ;;  %v1182_v13 = vld [vmem:[#allocation9 + $0x18] sm:$0xff]   ;;  %v1183_v14 = vld [vmem:[#allocation9 + $0x20] sm:$0xff]  }
  0xa4   : > { %s953_s11 = sshll.u32 %s1667_s29, 2  ;;  %1059 = vmatprep.subr.bf16.mxu1 %v1175_v5  ;;  %1076 = vmatpush3.bf16.msra.mxu0 %v1179_v10  ;;  %v1184_v15 = vld [vmem:[#allocation9 + $0x28] sm:$0xff]   ;;  %v956_v16 = vld [vmem:[#allocation4] ss:$0 sm:$0xff]  ;;  %v1185_v45 = vld [vmem:[#allocation9 + $0x30] sm:$0xff]  }
  0xa5   : > { %s354_s23 = scalar_lea.vmem %s1649_s0, %s953_s11  ;;  %1077 = vmatprep.subr.bf16.mxu0 %v1180_v11  ;;  %v1186_v46 = vld [vmem:[#allocation9 + $0x38] sm:$0xff]   ;;  %s360_s25 = scalar_lea.vmem %s1656_s7, %s953_s11 }
  0xa6   : > { %v1171_v2 = vld [vmem:[%s354_s23] sm:$0xff]   ;;  %v1172_v3 = vld [vmem:[%s354_s23 + $0x8] sm:$0xff]   ;;  %v1173_v4 = vld [vmem:[%s354_s23 + $0x10] sm:$0xff]  }
  0xa7   : > { %1051 = vmatprep.mubr.msk.bf16.mxu1 %vm399_vm1, %v1171_v2  ;;  %v1174_v7 = vld [vmem:[%s354_s23 + $0x18] sm:$0xff]   ;;  %v965_v47 = vld [vmem:[#allocation7] ss:$0 sm:$0xff] }
  0xa8   : > { %1052 = vmatmul.mubr.msk.bf16.vlgmr.msra.gmra.mrb[0].mxu1 %vm399_vm1, %v1172_v3  ;;  %1078 = vmatpush3.bf16.msra.mxu0 %v1180_v11 }
  0xa9   : > { %1055 = vmatprep.mubr.msk.bf16.mxu1 %vm399_vm1, %v1173_v4  ;;  %1060 = vmatpush3.bf16.msra.mxu1 %v1175_v5 }
  0xaa   : > { %1061 = vmatprep.subr.bf16.mxu1 %v1176_v6  ;;  %1079 = vmatprep.subr.bf16.mxu0 %v1181_v12 }
  0xac   : > { %1080 = vmatpush3.bf16.msra.mxu0 %v1181_v12  ;;  %v758_v12 = vlaneseq }
  0xad   : > { %1062 = vmatpush3.bf16.msra.mxu1 %v1176_v6  ;;  %1081 = vmatprep.subr.bf16.mxu0 %v1182_v13 }
  0xae   : > { %1063 = vmatprep.subr.bf16.mxu1 %v1177_v8 }
  0xb0   : > { %1056 = vmatmul.mubr.msk.bf16.gmra.mrb[4].mxu1 %vm399_vm1, %v1174_v7  ;;  %1082 = vmatpush3.bf16.msra.mxu0 %v1182_v13  ;;  %v974_v13 = vld [vmem:[#allocation10] ss:$0 sm:$0xff] }
  0xb1   : > { %1064 = vmatpush3.bf16.msra.mxu1 %v1177_v8  ;;  %1083 = vmatprep.subr.bf16.mxu0 %v1183_v14 }
  0xb2   : > { %1065 = vmatprep.subr.bf16.mxu1 %v1178_v9 }
  0xb4   : > { %1084 = vmatpush3.bf16.msra.mxu0 %v1183_v14 }
  0xb5   : > { %1066 = vmatpush3.bf16.msra.mxu1 %v1178_v9  ;;  %1085 = vmatprep.subr.bf16.mxu0 %v1184_v15 }
  0xb8   : > { %1086 = vmatpush3.bf16.msra.mxu0 %v1184_v15  ;;  %v759_v15 = vand.u32 127, %v758_v12 }
  0xb9   : > { %1087 = vmatprep.subr.bf16.mxu0 %v1185_v45 }
  0xba   : > { %vm760_vm3 = vcmp.ge.s32.totalorder %v759_v15, 60 }
  0xbc   : > { %1088 = vmatpush3.bf16.msra.mxu0 %v1185_v45 }
  0xbd   : > { %1089 = vmatprep.subr.bf16.mxu0 %v1186_v46 }
  0xc0   : > { %1090 = vmatpush3.bf16.msra.mxu0 %v1186_v46 }
 0x17b   : > { %v1053_v17 = vpop.f32.mrb[0].mxu1 }
 0x17c   : > { %v459_v18 = vadd.f32 %v1053_v17, %v956_v16  ;;  %v450_v19 = vpop.f32.mrb[1].mxu1 }
 0x17d   : > { %v451_v20 = vadd.f32 %v956_v16, %v450_v19  ;;  %v1054_v21 = vpop.f32.mrb[2].mxu1 }
 0x17e   : > { %v462_v22 = vadd.f32 %v1054_v21, %v956_v16  ;;  %v453_v23 = vpop.f32.mrb[3].mxu1  ;;  %v483_v25 = vmax.f32 %v459_v18, 0.0 }
 0x17f   : > { %v454_v24 = vadd.f32 %v956_v16, %v453_v23  ;;  %v481_v27 = vmax.f32 %v451_v20, 0.0 }
 0x180   : > { %v484_v26 = vmax.f32 %v462_v22, 0.0 }
 0x181   : > { %v482_v28 = vmax.f32 %v454_v24, 0.0 }
 0x182   : > { %v490_v29 = vpack.c.bf16 %v484_v26, %v483_v25 }
 0x183   : > { %v489_v30 = vpack.c.bf16 %v482_v28, %v481_v27  ;;  %v1057_v31 = vpop.f32.mrb[4].mxu1 }
 0x184   : > { %v475_v32 = vadd.f32 %v1057_v31, %v956_v16  ;;  %v466_v33 = vpop.f32.mrb[5].mxu1 }
 0x185   : > { %v467_v34 = vadd.f32 %v956_v16, %v466_v33  ;;  %v1058_v35 = vpop.f32.mrb[6].mxu1  ;;  %1067 = vmatprep.mubr.msk.bf16.mxu1 %vm532_vm2, %v489_v30 }
 0x186   : > { %v478_v36 = vadd.f32 %v1058_v35, %v956_v16  ;;  %v469_v37 = vpop.f32.mrb[7].mxu1  ;;  %1068 = vmatmul.mubr.msk.bf16.vlgmr.msra.gmra.mrb[8].mxu1 %vm532_vm2, %v490_v29  ;;  %v487_v39 = vmax.f32 %v475_v32, 0.0 }
 0x187   : > { %v470_v38 = vadd.f32 %v956_v16, %v469_v37  ;;  %v485_v41 = vmax.f32 %v467_v34, 0.0 }
 0x188   : > { %v488_v40 = vmax.f32 %v478_v36, 0.0 }
 0x189   : > { %v486_v42 = vmax.f32 %v470_v38, 0.0 }
 0x18a   : > { %v492_v43 = vpack.c.bf16 %v488_v40, %v487_v39 }
 0x18b   : > { %v491_v44 = vpack.c.bf16 %v486_v42, %v485_v41 }
 0x18d   : > { %1071 = vmatprep.mubr.msk.bf16.mxu1 %vm532_vm2, %v491_v44 }
 0x18e   : > { %1072 = vmatmul.mubr.msk.bf16.gmra.mrb[12].mxu1 %vm532_vm2, %v492_v43 }
 0x259   : > { %v1069_v48 = vpop.f32.mrb[8].mxu1 }
 0x25a   : > { %v588_v49 = vadd.f32 %v1069_v48, %v965_v47  ;;  %v579_v50 = vpop.f32.mrb[9].mxu1 }
 0x25b   : > { %v580_v51 = vadd.f32 %v965_v47, %v579_v50  ;;  %v1070_v52 = vpop.f32.mrb[10].mxu1 }
 0x25c   : > { %v591_v53 = vadd.f32 %v1070_v52, %v965_v47  ;;  %v582_v54 = vpop.f32.mrb[11].mxu1  ;;  %v612_v56 = vmax.f32 %v588_v49, 0.0 }
 0x25d   : > { %v583_v55 = vadd.f32 %v965_v47, %v582_v54  ;;  %v610_v58 = vmax.f32 %v580_v51, 0.0 }
 0x25e   : > { %v613_v57 = vmax.f32 %v591_v53, 0.0 }
 0x25f   : > { %v611_v59 = vmax.f32 %v583_v55, 0.0 }
 0x260   : > { %v619_v60 = vpack.c.bf16 %v613_v57, %v612_v56 }
 0x261   : > { %v1073_v61 = vpop.f32.mrb[12].mxu1  ;;  %v618_v62 = vpack.c.bf16 %v611_v59, %v610_v58 }
 0x262   : > { %v604_v63 = vadd.f32 %v1073_v61, %v965_v47  ;;  %v595_v0 = vpop.f32.mrb[13].mxu1 }
 0x263   : > { %v596_v1 = vadd.f32 %v965_v47, %v595_v0  ;;  %v1074_v2 = vpop.f32.mrb[14].mxu1  ;;  %1091 = vmatprep.mubr.bf16.mxu0 %v618_v62 }
 0x264   : > { %v607_v3 = vadd.f32 %v1074_v2, %v965_v47  ;;  %v598_v4 = vpop.f32.mrb[15].mxu1  ;;  %1092 = vmatmul.mubr.bf16.vlgmr.msra.gmra.mrb[0].mxu0 %v619_v60  ;;  %v616_v6 = vmax.f32 %v604_v63, 0.0 }
 0x265   : > { %v599_v5 = vadd.f32 %v965_v47, %v598_v4  ;;  %v614_v8 = vmax.f32 %v596_v1, 0.0 }
 0x266   : > { %v617_v7 = vmax.f32 %v607_v3, 0.0 }
 0x267   : > { %v615_v9 = vmax.f32 %v599_v5, 0.0 }
 0x268   : > { %v621_v10 = vpack.c.bf16 %v617_v7, %v616_v6 }
 0x269   : > { %v620_v11 = vpack.c.bf16 %v615_v9, %v614_v8 }
 0x26b   : > { %1095 = vmatprep.mubr.bf16.mxu0 %v620_v11 }
 0x26c   : > { %1096 = vmatmul.mubr.bf16.gmra.mrb[4].mxu0 %v621_v10 }
 0x337   : > { %v1093_v14 = vpop.f32.mrb[0].mxu0 }
 0x338   : > { %v736_v16 = vadd.f32 %v1093_v14, %v974_v13  ;;  %v727_v17 = vpop.f32.mrb[1].mxu0 }
 0x339   : > { %v728_v18 = vadd.f32 %v974_v13, %v727_v17  ;;  %v1094_v19 = vpop.f32.mrb[2].mxu0 }
 0x33a   : > { %v763_v20 = vmax.f32 %v736_v16, 0.0  ;;  %v739_v21 = vadd.f32 %v1094_v19, %v974_v13  ;;  %v730_v22 = vpop.f32.mrb[3].mxu0 }
 0x33b   : > { %v761_v23 = vmax.f32 %v728_v18, 0.0  ;;  %v731_v24 = vadd.f32 %v974_v13, %v730_v22 }
 0x33c   : > { %v764_v25 = vmax.f32 %v739_v21, 0.0  ;;  %v773_v27 = vsel %vm760_vm3, %v763_v20, %v736_v16 }
 0x33d   : > { %v762_v26 = vmax.f32 %v731_v24, 0.0  ;;  %v771_v29 = vsel %vm760_vm3, %v761_v23, %v728_v18 }
 0x33e   : > { %v774_v28 = vsel %vm760_vm3, %v764_v25, %v739_v21 }
 0x33f   : > { %v1009_v30 = vpack.c.bf16 %v774_v28, %v773_v27  ;;  %v772_v31 = vsel %vm760_vm3, %v762_v26, %v731_v24  ;;  %v1097_v32 = vpop.f32.mrb[4].mxu0 }
 0x340   : > { %v1004_v33 = vpack.c.bf16 %v772_v31, %v771_v29  ;;  %v752_v34 = vadd.f32 %v1097_v32, %v974_v13  ;;  %v743_v35 = vpop.f32.mrb[5].mxu0 }
 0x341   : > { %1021 = vst [vmem:[%s360_s25 + $0x8] sm:$0xff] %v1009_v30   ;;  %v744_v36 = vadd.f32 %v974_v13, %v743_v35  ;;  %v1098_v37 = vpop.f32.mrb[6].mxu0 }
 0x342   : > { %1005 = vst [vmem:[%s360_s25] sm:$0xff] %v1004_v33   ;;  %v767_v38 = vmax.f32 %v752_v34, 0.0  ;;  %v755_v39 = vadd.f32 %v1098_v37, %v974_v13  ;;  %v746_v40 = vpop.f32.mrb[7].mxu0 }
 0x343   : > { %v765_v41 = vmax.f32 %v744_v36, 0.0  ;;  %v747_v42 = vadd.f32 %v974_v13, %v746_v40 }
 0x344   : > { %v768_v43 = vmax.f32 %v755_v39, 0.0  ;;  %v777_v45 = vsel %vm760_vm3, %v767_v38, %v752_v34 }
 0x345   : > { %v766_v44 = vmax.f32 %v747_v42, 0.0  ;;  %v775_v47 = vsel %vm760_vm3, %v765_v41, %v744_v36 }
 0x346   : > { %v778_v46 = vsel %vm760_vm3, %v768_v43, %v755_v39 }
 0x347   : > { %v1019_v48 = vpack.c.bf16 %v778_v46, %v777_v45  ;;  %v776_v49 = vsel %vm760_vm3, %v766_v44, %v747_v42 }
 0x348   : > { %v1014_v50 = vpack.c.bf16 %v776_v49, %v775_v47 }
 0x349   : > { %1023 = vst [vmem:[%s360_s25 + $0x18] sm:$0xff] %v1019_v48  }
 0x34a   : > { %1022 = vst [vmem:[%s360_s25 + $0x10] sm:$0xff] %v1014_v50  }
 0x34b PF: > { %s21_s24 = sadd.s32 1, %s1377_s24  }
 0x34c   : > { %p18_p7 = scmp.ge.s32.totalorder %s21_s24, 10  }
 0x34e   :  { %20 = sbr.rel (!%p18_p7) target bundleno = 4 (0x4), region = 103 }
 0x355   :  { %841 = vsyncpa [#allocation3], 1 }
 0x356   :  { %843 = vsyncpa [#allocation3 + $0x1], 1 }
 0x357   :  { %844 = vsyncpa [#allocation5], 1 }
 0x358   :  { %845 = vsyncpa [#allocation8], 1 }
 0x359   :  { %846 = vsyncpa [#allocation11], 1 }

</bundles_post_ra>
